<compile_context>
chip_gen: v6e
topology: v6e:2x2x1
jax: 0.10.0
libtpu: 0.0.40
codegen_flags: <defaults>
</compile_context>

<pallas_src>
import jax
import jax.numpy as jnp
from jax.experimental import pallas as pl
from jax.experimental.pallas import tpu as pltpu


def _fusion_kernel(b_ref, w_ref, f1_ref, f2_ref, o_ref):
    # b_ref : SMEM bias, shape (1,), f32
    # w_ref : (2, D) stacked f32 weight rows (row 0 -> f1, row 1 -> f2), resident
    # f1_ref, f2_ref, o_ref : (TB, D) tiles in the input dtype
    f1 = f1_ref[...]
    f2 = f2_ref[...]
    w1 = w_ref[0:1, :]                      # (1, D) f32, broadcasts over batch
    w2 = w_ref[1:2, :]                      # (1, D) f32

    # Linear(2D, 1): the concat never materializes.  Mixed-dtype mul promotes
    # the features to f32, so the lane reduction and sigmoid run in f32.
    logits = jnp.sum(f1 * w1 + f2 * w2, axis=-1, keepdims=True) + b_ref[0]  # (TB,1) f32
    gate = jax.nn.sigmoid(logits)                                           # (TB,1) f32

    # diff-form blend in the native input dtype:
    #   gate*f1 + (1-gate)*f2 == f2 + gate*(f1 - f2)
    o_ref[...] = (f2 + gate.astype(f1.dtype) * (f1 - f2)).astype(o_ref.dtype)


def attention_fusion5(feature_1, feature_2, W, b):
    """feature_1, feature_2: [B, D] (f32 or bf16); W: [1, 2D]; b: [1]."""
    B, D = feature_1.shape
    assert feature_2.shape == (B, D)
    assert W.shape == (1, 2 * D) and b.shape == (1,)

    itemsize = jnp.dtype(feature_1.dtype).itemsize

    # --- chip-aware VMEM budget (v5e/v6e: 128 MiB, v7x: 64 MiB per TC) -------
    try:
        vmem_cap = pltpu.get_tpu_info().vmem_capacity_bytes
    except Exception:  # pragma: no cover - conservative (v7x-sized) fallback
        vmem_cap = 64 * 1024 * 1024
    vmem_limit = min((vmem_cap * 3) // 4, 96 * 1024 * 1024)

    # 3 streamed arrays (f1, f2, out) x 2 pipeline buffers each, plus ~2x
    # headroom for compiler-internal scratch -> per-buffer tile target.
    tile_bytes = max(512 * 1024, vmem_limit // 12)

    # --- batch tile: multiple of 8 sublanes, byte-budgeted, <= round_up(B,8) --
    TB = max(8, 8 * ((tile_bytes // max(1, D * itemsize)) // 8))
    TB = min(TB, 8 * pl.cdiv(B, 8))        # single grid step whenever B fits

    # v7x: if there are multiple grid steps, prefer an even count so the two
    # TensorCores split the ("parallel",) axis evenly.  Harmless on 1-TC chips.
    steps = pl.cdiv(B, TB)
    if steps > 1 and steps % 2 == 1:
        TB = max(8, 8 * pl.cdiv(pl.cdiv(B, steps + 1), 8))
        steps = pl.cdiv(B, TB)

    # --- small resident operands (cast hoisted out of the kernel) ------------
    w_stacked = jnp.stack([W[0, :D], W[0, D:]], axis=0).astype(jnp.float32)  # (2, D)
    bias = b.astype(jnp.float32)                                             # (1,)

    cost = pl.CostEstimate(
        flops=6 * B * D,
        transcendentals=B,                                   # one sigmoid per row
        bytes_accessed=3 * B * D * itemsize + (2 * D + 1) * 4,
    )

    return pl.pallas_call(
        _fusion_kernel,
        out_shape=jax.ShapeDtypeStruct((B, D), feature_1.dtype),
        grid_spec=pltpu.PrefetchScalarGridSpec(
            num_scalar_prefetch=0,
            grid=(steps,),
            in_specs=[
                pl.BlockSpec(memory_space=pltpu.SMEM),        # bias (1,) f32
                pl.BlockSpec((2, D), lambda i: (0, 0)),       # stacked W (resident)
                pl.BlockSpec((TB, D), lambda i: (i, 0)),      # feature_1 tile
                pl.BlockSpec((TB, D), lambda i: (i, 0)),      # feature_2 tile
            ],
            out_specs=pl.BlockSpec((TB, D), lambda i: (i, 0)),
        ),
        compiler_params=pltpu.CompilerParams(
            dimension_semantics=("parallel",),
            vmem_limit_bytes=vmem_limit,
        ),
        cost_estimate=cost,
    )(bias, w_stacked, feature_1, feature_2)


def _reference(feature_1, feature_2, W, b):
    feature = jnp.concatenate([feature_1, feature_2], axis=1)
    weight = jax.nn.sigmoid(feature @ W.T + b)        # [B, 1]
    return weight * feature_1 + (1.0 - weight) * feature_2


if __name__ == "__main__":
    B, D = 16, 32  # batch=16, feature_dim=32 (single grid step, full-D lane block)

    key = jax.random.PRNGKey(0)
    k1, k2, kw, kb = jax.random.split(key, 4)

    feature_1 = jax.random.normal(k1, (B, D), dtype=jnp.float32)
    feature_2 = jax.random.normal(k2, (B, D), dtype=jnp.float32)

    # nn.Linear(2D, 1) default init: U(-1/sqrt(2D), 1/sqrt(2D)) for both W and b.
    bound = 1.0 / jnp.sqrt(2.0 * D)
    W = jax.random.uniform(kw, (1, 2 * D), minval=-bound, maxval=bound,
                           dtype=jnp.float32)
    b = jax.random.uniform(kb, (1,), minval=-bound, maxval=bound,
                           dtype=jnp.float32)

    out = attention_fusion5(feature_1, feature_2, W, b)
    out = jax.block_until_ready(out)

    ref = _reference(feature_1, feature_2, W, b)
    assert out.shape == (B, D)
    assert jnp.allclose(out, ref, atol=1e-5, rtol=1e-5), "mismatch vs reference"

    print("KERNEL_OK")
</pallas_src>

<mosaic_0001>
module attributes {stable_mosaic.version = 11 : i64} {
  func.func @_fusion_kernel(%arg0: i32, %arg1: memref<1xf32, #tpu.memory_space<smem>>, %arg2: memref<2x32xf32, #tpu.memory_space<vmem>>, %arg3: memref<16x32xf32, #tpu.memory_space<vmem>>, %arg4: memref<16x32xf32, #tpu.memory_space<vmem>>, %arg5: memref<16x32xf32, #tpu.memory_space<vmem>>) attributes {dimension_semantics = [#tpu.dimension_semantics<parallel>], iteration_bounds = array<i64: 1>, scalar_prefetch = 0 : i64, scratch_operands = 0 : i64, tpu.core_type = #tpu.core_type<tc>, window_params = [{transform_indices = @transform_0, window_bounds = array<i64: 1>}, {pipeline_mode = #tpu.pipeline_mode<synchronous>, transform_indices = @transform_1, window_bounds = array<i64: 2, 32>}, {transform_indices = @transform_2, window_bounds = array<i64: 16, 32>}, {transform_indices = @transform_3, window_bounds = array<i64: 16, 32>}, {transform_indices = @transform_4, window_bounds = array<i64: 16, 32>}]} {
    %c0 = arith.constant 0 : index
    %c0_0 = arith.constant 0 : index
    %0 = vector.load %arg3[%c0, %c0_0] : memref<16x32xf32, #tpu.memory_space<vmem>>, vector<16x32xf32>
    %c0_1 = arith.constant 0 : index
    %c0_2 = arith.constant 0 : index
    %1 = vector.load %arg4[%c0_1, %c0_2] : memref<16x32xf32, #tpu.memory_space<vmem>>, vector<16x32xf32>
    %c0_3 = arith.constant 0 : index
    %c0_4 = arith.constant 0 : index
    %2 = vector.load %arg2[%c0_3, %c0_4] : memref<2x32xf32, #tpu.memory_space<vmem>>, vector<1x32xf32>
    %c1 = arith.constant 1 : index
    %c0_5 = arith.constant 0 : index
    %3 = vector.load %arg2[%c1, %c0_5] : memref<2x32xf32, #tpu.memory_space<vmem>>, vector<1x32xf32>
    %4 = vector.broadcast %2 : vector<1x32xf32> to vector<16x32xf32>
    %5 = arith.mulf %0, %4 : vector<16x32xf32>
    %6 = vector.broadcast %3 : vector<1x32xf32> to vector<16x32xf32>
    %7 = arith.mulf %1, %6 : vector<16x32xf32>
    %8 = arith.addf %5, %7 : vector<16x32xf32>
    %cst = arith.constant dense<0.000000e+00> : vector<16xf32>
    %9 = vector.multi_reduction <add>, %8, %cst [1] : vector<16x32xf32> to vector<16xf32>
    %10 = vector.shape_cast %9 : vector<16xf32> to vector<16x1xf32>
    %c0_6 = arith.constant 0 : index
    %11 = memref.load %arg1[%c0_6] : memref<1xf32, #tpu.memory_space<smem>>
    %12 = vector.broadcast %11 : f32 to vector<16x1xf32>
    %13 = arith.addf %10, %12 : vector<16x1xf32>
    %14 = arith.negf %13 : vector<16x1xf32>
    %15 = math.exp %14 : vector<16x1xf32>
    %cst_7 = arith.constant 1.000000e+00 : f32
    %16 = vector.broadcast %cst_7 : f32 to vector<16x1xf32>
    %17 = arith.addf %16, %15 : vector<16x1xf32>
    %18 = arith.divf %16, %17 : vector<16x1xf32>
    %19 = arith.subf %0, %1 : vector<16x32xf32>
    %20 = vector.broadcast %18 : vector<16x1xf32> to vector<16x32xf32>
    %21 = arith.mulf %20, %19 : vector<16x32xf32>
    %22 = arith.addf %1, %21 : vector<16x32xf32>
    %c0_8 = arith.constant 0 : index
    %c0_9 = arith.constant 0 : index
    %23 = vector.load %arg5[%c0_8, %c0_9] : memref<16x32xf32, #tpu.memory_space<vmem>>, vector<16x32xf32>
    tpu.vector_store %arg5[%c0_8, %c0_9], %22 {strides = array<i32>} : memref<16x32xf32, #tpu.memory_space<vmem>>, vector<16x32xf32>,
    return
  }
  func.func @transform_0(%arg0: i32) -> i32 {
    %c0_i32 = arith.constant 0 : i32
    %c0_i32_0 = arith.constant 0 : i32
    return %c0_i32 : i32
  }
  func.func @transform_1(%arg0: i32) -> (i32, i32) {
    %c0_i32 = arith.constant 0 : i32
    %c0_i32_0 = arith.constant 0 : i32
    %c0_i32_1 = arith.constant 0 : i32
    return %c0_i32, %c0_i32_0 : i32, i32
  }
  func.func @transform_2(%arg0: i32) -> (i32, i32) {
    %c0_i32 = arith.constant 0 : i32
    %c0_i32_0 = arith.constant 0 : i32
    return %arg0, %c0_i32 : i32, i32
  }
  func.func @transform_3(%arg0: i32) -> (i32, i32) {
    %c0_i32 = arith.constant 0 : i32
    %c0_i32_0 = arith.constant 0 : i32
    return %arg0, %c0_i32 : i32, i32
  }
  func.func @transform_4(%arg0: i32) -> (i32, i32) {
    %c0_i32 = arith.constant 0 : i32
    %c0_i32_0 = arith.constant 0 : i32
    return %arg0, %c0_i32 : i32, i32
  }
}

</mosaic_0001>

<bundles_post_ra>
// kernel: tpu_custom_call.1
= control target key start
LH: loop header
LB: loop body
LE: loop exit
PB: predicated region body
PF: predicated region fallthrough
CT: control target
= control target key end

     0   :  { %10 = vsyncpa [#allocation4], 0  ;;  %s260_s0 = inlined_call_operand.<no memory space> [shape: f32[1], index: 0, kind: input, shape index: {}]   ;;  %s261_s1 = inlined_call_operand.vmem [shape: f32[2,32], index: 1, kind: input, shape index: {}]   ;;  %s262_s2 = inlined_call_operand.hbm [shape: f32[16,32], index: 2, kind: input, shape index: {}]   ;;  %s263_s3 = inlined_call_operand.hbm [shape: f32[16,32], index: 3, kind: input, shape index: {}]   ;;  %s264_s4 = inlined_call_operand.hbm [shape: f32[16,32], index: 4, kind: output, shape index: {}]  }
   0x1   :  { %11 = vsyncpa [#allocation7], 0 }
   0x2   :  { %12 = vsyncpa [#allocation5], 0  ;;  %s199_s15 = smov [#allocation3]  }
   0x3   :  { %s22_s16 = sshll.u32 %s199_s15, 4  ;;  %s23_s16 = int_to_ptr.vmem [resolvable:$true] %s22_s16 }
   0x4   :  { %s141_s17 = scalar_lea.vmem %s23_s16, 256  ;;  %p146_p1 = scmp.lt.s32.totalorder %s23_s16, %s23_s16 }
   0x5   :  { %p142_p0 = scmp.ne.s32.totalorder %s23_s16, %s141_s17  ;;  %p147_p2 = scmp.lt.s32.totalorder %s141_s17, %s141_s17 }
   0x7   :  { %p148_p3 = por %p147_p2, %p146_p1 }
   0x9   :  { %p149_p4 = pnand %p148_p3, %p142_p0 }
   0xb   :  { %152 = shalt.err (!%p149_p4)
}
   0xc   :  { %s200_s18 = smov 128   ;;  %s201_s19 = smov 8  }
   0xd   :  { %28 = dma.hbm_to_vmem [thread:$0]  %s262_s2, 256, %s23_s16, [#allocation4], %s200_s18, %s200_s18, %s201_s19  }
   0xe   :  { %s202_s22 = smov [#allocation6]  }
   0xf   :  { %s34_s23 = sshll.u32 %s202_s22, 4  ;;  %s35_s23 = int_to_ptr.vmem [resolvable:$true] %s34_s23 }
  0x10   :  { %s161_s24 = scalar_lea.vmem %s35_s23, 256  ;;  %p166_p6 = scmp.lt.s32.totalorder %s35_s23, %s35_s23 }
  0x11   :  { %p162_p5 = scmp.ne.s32.totalorder %s35_s23, %s161_s24  ;;  %p167_p7 = scmp.lt.s32.totalorder %s161_s24, %s161_s24 }
  0x13   :  { %p168_p8 = por %p167_p7, %p166_p6 }
  0x15   :  { %p169_p9 = pnand %p168_p8, %p162_p5 }
  0x17   :  { %172 = shalt.err (!%p169_p9)
}
  0x18   :  { %40 = dma.hbm_to_vmem [thread:$0]  %s263_s3, 256, %s35_s23, [#allocation7], %s200_s18, %s200_s18, %s201_s19  }
  0x19   :  { %193 = dma.done.wait [#allocation4], 256  }
  0x1a   :  { %194 = vsyncadd [#allocation4], 4294967040 }
  0x1b   :  { %195 = dma.done.wait [#allocation7], 256  }
  0x1c   :  { %196 = vsyncadd [#allocation7], 4294967040  ;;  %v47_v0 = vld [vmem:[#allocation3] sm:$0xff]  ;;  %v49_v1 = vld [vmem:[#allocation6] sm:$0xff]  ;;  %vm67_vm0 = vcmask 261120   ;;  %v75_v14 = vstv %s260_s0  ;;  %s203_s0 = smov [#allocation8]  }
  0x1d   :  { %v116_v2 = vld [vmem:[%s261_s1] ss:$0 sm:$0xff]  ;;  %v117_v3 = vld [vmem:[%s261_s1 + $0x1] ss:$0 sm:$0xff]  ;;  %v48_v5 = vld [vmem:[#allocation3 + $0x8] sm:$0xff]  ;;  %v90_v25 = vsub.f32 %v47_v0, %v49_v1  ;;  %s103_s1 = sshll.u32 %s203_s0, 4  ;;  %s104_s1 = int_to_ptr.vmem [resolvable:$true] %s103_s1 }
  0x1e   :  { %v57_v4 = vmul.f32 %v116_v2, %v47_v0  ;;  %v50_v6 = vld [vmem:[#allocation6 + $0x8] sm:$0xff]  ;;  %v63_v7 = vmul.f32 %v117_v3, %v49_v1  ;;  %v58_v8 = vmul.f32 %v116_v2, %v48_v5  ;;  %s173_s5 = scalar_lea.vmem %s104_s1, 256  ;;  %p178_p11 = scmp.lt.s32.totalorder %s104_s1, %s104_s1 }
  0x1f   :  { %v64_v9 = vmul.f32 %v117_v3, %v50_v6  ;;  %v91_v27 = vsub.f32 %v48_v5, %v50_v6  ;;  %p174_p10 = scmp.ne.s32.totalorder %s104_s1, %s173_s5  ;;  %p179_p12 = scmp.lt.s32.totalorder %s173_s5, %s173_s5 }
  0x20   :  { %v65_v10 = vadd.f32 %v63_v7, %v57_v4 }
  0x21   :  { %v66_v11 = vadd.f32 %v64_v9, %v58_v8  ;;  %p180_p13 = por %p179_p12, %p178_p11 }
  0x22   :  { %v68_v12 = vsel %vm67_vm0, %v65_v10, 0.0 }
  0x23   :  { %69 = vadd.xlane.f32.xlu0 %v68_v12  ;;  %v71_v13 = vsel %vm67_vm0, %v66_v11, 0.0  ;;  %p181_p0 = pnand %p180_p13, %p174_p10 }
  0x27   :  { %72 = vadd.xlane.f32.xlu0 %v71_v13 }
  0xac   :  { %v70_v15 = vpop.xlane.xlu0 %69 }
  0xad   :  { %v76_v16 = vadd.f32 %v75_v14, %v70_v15 }
  0xaf   :  { %v118_v17 = vmul.f32 -1.442695, %v76_v16 }
  0xb0   :  { %v73_v18 = vpop.xlane.xlu0 %72 }
  0xb1   :  { %125 = vpow2.f32 %v118_v17  ;;  %v77_v19 = vadd.f32 %v75_v14, %v73_v18 }
  0xb3   :  { %v119_v20 = vmul.f32 -1.442695, %v77_v19 }
  0xb5   :  { %127 = vpow2.f32 %v119_v20 }
  0xbe   :  { %v126_v21 = vpop.eup %125 }
  0xbf   :  { %v84_v22 = vadd.f32 1.0, %v126_v21 }
  0xc1   :  { %129 = vrcp.f32 %v84_v22 }
  0xc2   :  { %v128_v23 = vpop.eup %127 }
  0xc3   :  { %v85_v24 = vadd.f32 1.0, %v128_v23 }
  0xc5   :  { %131 = vrcp.f32 %v85_v24 }
  0xce   :  { %v130_v26 = vpop.eup %129 }
  0xcf   :  { %v92_v28 = vmul.f32 %v130_v26, %v90_v25 }
  0xd1   :  { %v94_v29 = vadd.f32 %v92_v28, %v49_v1 }
  0xd2   :  { %v132_v30 = vpop.eup %131 }
  0xd3   :  { %v93_v31 = vmul.f32 %v132_v30, %v91_v27  ;;  %96 = vst.msk [vmem:[#allocation8] sm:$0xff] %vm67_vm0, %v94_v29 }
  0xd5   :  { %v95_v32 = vadd.f32 %v93_v31, %v50_v6 }
  0xd7   :  { %97 = vst.msk [vmem:[#allocation8 + $0x8] sm:$0xff] %vm67_vm0, %v95_v32 }
  0xd8   :  { %184 = shalt.err (!%p181_p0)
}
  0xd9   :  { %109 = dma.vmem_to_hbm [thread:$0]  %s104_s1, 256, %s264_s4, [#allocation5], %s200_s18, %s200_s18, %s201_s19  }
  0xda   :  { %197 = dma.done.wait [#allocation5], 256  }
  0xdb   :  { %198 = vsyncadd [#allocation5], 4294967040 }
  0xdc   :  { %113 = vsyncpa [#allocation4], 1 }
  0xdd   :  { %114 = vsyncpa [#allocation7], 1 }
  0xde   :  { %115 = vsyncpa [#allocation5], 1 }

</bundles_post_ra>
